<compile_context>
chip_gen: v5e
topology: v5e:2x2
jax: 0.10.0
libtpu: 0.0.40
codegen_flags: <defaults>
</compile_context>

<pallas_src>
import jax
import jax.numpy as jnp
from jax.experimental import pallas as pl
from jax.experimental.pallas import tpu as pltpu

EPS = 1e-6            # torchvision ConvNeXt uses LayerNorm eps=1e-6 everywhere
LAYER_SCALE = 1e-6    # torchvision default layer_scale init value
MATMUL_DTYPE = jnp.bfloat16   # MXU operand dtype (f32 accumulation everywhere)
ACT_DTYPE = jnp.bfloat16      # inter-kernel activation dtype in HBM
MLP_CHUNK_ROWS = 512          # max rows of the [rows, 4C] MLP intermediate live at once

# ----------------------------------------------------------------------------
# in-kernel helpers
# ----------------------------------------------------------------------------
_USE_ERF = [True]     # set by _maybe_probe_erf(); erf preferred (matches torch exact GELU)
_ERF_PROBED = [False]
_DW_DTYPE = [None]    # depthwise tap dtype: bf16 on v6e/v7x (bf16 VPU), f32 on v5e and older


def _maybe_probe_erf():
    """Check (once) whether lax.erf lowers in a Pallas TPU kernel; else use tanh GELU."""
    if _ERF_PROBED[0]:
        return
    _ERF_PROBED[0] = True

    def k(x_ref, o_ref):
        o_ref[...] = jax.lax.erf(x_ref[...])

    try:
        out = pl.pallas_call(
            k, out_shape=jax.ShapeDtypeStruct((8, 128), jnp.float32)
        )(jnp.zeros((8, 128), jnp.float32))
        jax.block_until_ready(out)
        _USE_ERF[0] = True
    except Exception:
        _USE_ERF[0] = False


def _depthwise_dtype():
    """bf16 depthwise taps where the VPU supports bf16 (v6e/v7x); f32 otherwise (v5e-)."""
    if _DW_DTYPE[0] is None:
        kind = ""
        try:
            kind = jax.devices()[0].device_kind.lower()
        except Exception:
            pass
        if any(t in kind for t in ("v2", "v3", "v4", "v5")):
            _DW_DTYPE[0] = jnp.float32
        else:
            _DW_DTYPE[0] = jnp.bfloat16
    return _DW_DTYPE[0]


def _gelu(x):
    """Exact (erf-based) GELU matching torch.nn.GELU(); tanh-approx fallback on EUP."""
    if _USE_ERF[0]:
        return 0.5 * x * (1.0 + jax.lax.erf(x * 0.7071067811865476))
    # TODO(synk): tanh-approx GELU differs from torch's exact GELU by <1e-3; used only
    # when lax.erf does not lower on this toolchain.
    c = 0.7978845608028654  # sqrt(2/pi)
    return 0.5 * x * (1.0 + jnp.tanh(c * (x + 0.044715 * x * x * x)))


def _layernorm(x, g, b):
    """Single-pass LayerNorm over the last axis (f32 math, biased var, eps inside sqrt)."""
    mu = jnp.mean(x, axis=-1, keepdims=True)
    ms = jnp.mean(x * x, axis=-1, keepdims=True)
    var = jnp.maximum(ms - mu * mu, 0.0)
    return (x - mu) * jax.lax.rsqrt(var + EPS) * g + b


# ----------------------------------------------------------------------------
# Pallas kernels
# ----------------------------------------------------------------------------
def linear_ln_kernel(x_ref, w_ref, b_ref, g_ref, beta_ref, o_ref):
    # stem: patchified 4x4/stride-4 conv (as matmul, bf16 operands) + bias + LayerNorm
    h = jnp.dot(x_ref[...].astype(w_ref.dtype), w_ref[...],
                preferred_element_type=jnp.float32) + b_ref[...]
    o_ref[...] = _layernorm(h, g_ref[...], beta_ref[...]).astype(o_ref.dtype)


def downsample_kernel(x_ref, g_ref, beta_ref, w_ref, b_ref, o_ref):
    # Fused LayerNorm + 2x2/stride-2 conv. x_ref: [1, 2*th, W, C] activation stripe
    # (read directly via BlockSpec — no wrapper patch gather). The 4 taps are folded
    # into the contraction dim: one K=4C matmul against w_ref [4C, Cn].
    _, th2, W, C = x_ref.shape
    th, Wn = th2 // 2, W // 2

    ln = _layernorm(x_ref[...].astype(jnp.float32), g_ref[...], beta_ref[...])
    # regroup [1, 2*th, W, C] -> [th, 2(ky), Wn, 2C(kx,C)] (pure contiguous reshape),
    # then concatenate the two ky rows along lanes -> [th, Wn, 4C] with column order
    # (ky*2 + kx)*C + c, matching the weight layout built in init_params.
    h = ln.reshape(th, 2, Wn, 2 * C)
    h = jnp.concatenate([h[:, 0, :, :], h[:, 1, :, :]], axis=-1)
    h = h.reshape(th * Wn, 4 * C).astype(w_ref.dtype)

    acc = jnp.dot(h, w_ref[...], preferred_element_type=jnp.float32) + b_ref[...]
    o_ref[...] = acc.reshape(o_ref.shape).astype(o_ref.dtype)


def cnblock_kernel(x_ref, dww_ref, dwb_ref, g_ref, beta_ref,
                   w1_ref, b1_ref, w2_ref, b2_ref, ls_ref, o_ref, xpad_s):
    # x_ref: [1, H, W, C] (ACT_DTYPE); xpad_s: VMEM scratch [1, H+6, W+11, C] in the
    # depthwise dtype. Interior lives at (row 3, col 8): the big copy is sublane-aligned.
    _, H, W, C = x_ref.shape
    WOFF = 8          # multiple-of-8 sublane offset along W for the interior copy
    Wp = W + 11

    # Halo-only zeroing (thin strips, every step — correct even when the batch grid axis
    # is split across megacore TCs; the interior is fully overwritten below).
    xpad_s[:, 0:3, :, :] = jnp.zeros((1, 3, Wp, C), xpad_s.dtype)
    xpad_s[:, 3 + H:6 + H, :, :] = jnp.zeros((1, 3, Wp, C), xpad_s.dtype)
    xpad_s[:, 3:3 + H, WOFF - 3:WOFF, :] = jnp.zeros((1, H, 3, C), xpad_s.dtype)
    xpad_s[:, 3:3 + H, WOFF + W:WOFF + W + 3, :] = jnp.zeros((1, H, 3, C), xpad_s.dtype)
    # interior copy (unmasked sublane-aligned store)
    xpad_s[:, 3:3 + H, WOFF:WOFF + W, :] = x_ref[...].astype(xpad_s.dtype)

    xp = xpad_s[...]
    dww = dww_ref[...]          # [49, C]  (k = dy*7 + dx), bf16 on v6e/v7x, f32 on v5e
    dwb = dwb_ref[...]          # [1, C] f32

    # depthwise 7x7: 7 hoisted column (sublane) shifts, cheap major-dim row shifts;
    # multiply in the depthwise dtype, accumulate in f32; conv bias folded into tap 0.
    acc = None
    for dx in range(7):
        xs = xp[:, :, WOFF - 3 + dx:WOFF - 3 + dx + W, :]      # [1, H+6, W, C]
        for dy in range(7):
            term = xs[:, dy:dy + H, :, :] * dww[dy * 7 + dx, :]
            if acc is None:
                acc = term.astype(jnp.float32) + dwb
            else:
                acc = acc + term                               # promotes to f32

    g = g_ref[...]
    beta = beta_ref[...]
    ls = ls_ref[...]

    # LayerNorm + pointwise MLP (Linear 4x -> GELU -> Linear) + layer_scale + residual,
    # chunked over H-row stripes so the [rows, 4C] intermediate is never fully live.
    stripe = H if (H * W) <= MLP_CHUNK_ROWS else max(1, MLP_CHUNK_ROWS // W)
    for h0 in range(0, H, stripe):
        hs = min(stripe, H - h0)
        hh = _layernorm(acc[:, h0:h0 + hs, :, :], g, beta).reshape(hs * W, C)
        z = jnp.dot(hh.astype(w1_ref.dtype), w1_ref[...],
                    preferred_element_type=jnp.float32) + b1_ref[...]
        z = _gelu(z)
        z = jnp.dot(z.astype(w2_ref.dtype), w2_ref[...],
                    preferred_element_type=jnp.float32) + b2_ref[...]
        z = z.reshape(1, hs, W, C)
        # TODO(synk): StochasticDepth is identity at inference; training-mode drop not implemented.
        res = x_ref[:, h0:h0 + hs, :, :].astype(jnp.float32)
        o_ref[:, h0:h0 + hs, :, :] = (res + ls * z).astype(o_ref.dtype)


def head_kernel(x_ref, g_ref, beta_ref, w_ref, b_ref, o_ref):
    # x_ref: [B, H*W, C] -> global average pool (f32) -> LayerNorm -> Linear
    pooled = jnp.mean(x_ref[...].astype(jnp.float32), axis=1)   # [B, C]
    h = _layernorm(pooled, g_ref[...], beta_ref[...])
    o_ref[...] = jnp.dot(h.astype(w_ref.dtype), w_ref[...],
                         preferred_element_type=jnp.float32) + b_ref[...]


# ----------------------------------------------------------------------------
# pallas_call wrappers
# ----------------------------------------------------------------------------
def _pick_row_tile(rows, max_tile=1024):
    """Largest multiple-of-8 divisor of `rows` that is <= max_tile (or rows itself)."""
    if rows <= max_tile:
        return rows
    t = max_tile - (max_tile % 8)
    while t >= 8:
        if rows % t == 0:
            return t
        t -= 8
    return rows


def rowtiled_call(kernel, x, params, out_cols, out_dtype):
    """Row-tiled (pipelined, megacore-parallel) call: x is [rows, K], params are small."""
    rows = x.shape[0]
    tm = _pick_row_tile(rows)
    xspec = pl.BlockSpec((tm,) + x.shape[1:],
                         lambda i, _n=x.ndim: (i,) + (0,) * (_n - 1))
    pspecs = [pl.BlockSpec(a.shape, lambda i, n=a.ndim: (0,) * n) for a in params]
    return pl.pallas_call(
        kernel,
        out_shape=jax.ShapeDtypeStruct((rows, out_cols), out_dtype),
        grid=(rows // tm,),
        in_specs=[xspec] + pspecs,
        out_specs=pl.BlockSpec((tm, out_cols), lambda i: (i, 0)),
        compiler_params=pltpu.CompilerParams(dimension_semantics=("parallel",)),
    )(x, *params)


def cnblock_call(x, p):
    """Fused CNBlock, gridded over batch (one image per grid step), padding done in-kernel."""
    B, H, W, C = x.shape
    dw_dtype = p['dww'].dtype
    params = (p['dww'], p['dwb'], p['g'], p['beta'],
              p['w1'], p['b1'], p['w2'], p['b2'], p['ls'])
    param_specs = [pl.BlockSpec(a.shape, lambda b, n=a.ndim: (0,) * n) for a in params]
    # TODO(synk): at real resolutions (56x56, C>=96) also grid over H-stripes with a 3-row
    # halo (manual DMA) so each TC gets many pipeline steps under v7x's 64 MiB VMEM.
    return pl.pallas_call(
        cnblock_kernel,
        out_shape=jax.ShapeDtypeStruct((B, H, W, C), ACT_DTYPE),
        grid=(B,),
        in_specs=[pl.BlockSpec((1, H, W, C), lambda b: (b, 0, 0, 0))] + param_specs,
        out_specs=pl.BlockSpec((1, H, W, C), lambda b: (b, 0, 0, 0)),
        scratch_shapes=[pltpu.VMEM((1, H + 6, W + 11, C), dw_dtype)],
        compiler_params=pltpu.CompilerParams(
            dimension_semantics=("parallel",),
            vmem_limit_bytes=48 * 1024 * 1024),   # under v7x's 64 MiB physical VMEM
    )(x, *params)


def downsample_call(x, p):
    """Fused LN + 2x2/stride-2 conv, gridded over (batch, output-row stripes)."""
    B, H, W, C = x.shape
    Hn, Wn = H // 2, W // 2
    Cn = p['w'].shape[1]
    budget = 2 * 1024 * 1024   # per-step input stripe budget (bytes)
    th = 1
    for cand in range(Hn, 0, -1):
        if Hn % cand == 0 and (2 * cand) * W * C * x.dtype.itemsize <= budget:
            th = cand
            break
    params = (p['g'], p['beta'], p['w'], p['b'])
    param_specs = [pl.BlockSpec(a.shape, lambda b, i, n=a.ndim: (0,) * n) for a in params]
    return pl.pallas_call(
        downsample_kernel,
        out_shape=jax.ShapeDtypeStruct((B, Hn, Wn, Cn), ACT_DTYPE),
        grid=(B, Hn // th),
        in_specs=[pl.BlockSpec((1, 2 * th, W, C), lambda b, i: (b, i, 0, 0))] + param_specs,
        out_specs=pl.BlockSpec((1, th, Wn, Cn), lambda b, i: (b, i, 0, 0)),
        compiler_params=pltpu.CompilerParams(
            dimension_semantics=("parallel", "parallel")),
    )(x, *params)


def head_call(x, p, num_classes):
    B = x.shape[0]
    args = (x, p['g'], p['beta'], p['w'], p['b'])
    return pl.pallas_call(
        head_kernel,
        out_shape=jax.ShapeDtypeStruct((B, num_classes), jnp.float32),
        in_specs=[pl.BlockSpec(memory_space=pltpu.MemorySpace.VMEM)] * len(args),
        out_specs=pl.BlockSpec(memory_space=pltpu.MemorySpace.VMEM),
    )(*args)


# ----------------------------------------------------------------------------
# parameter init (deterministic, synthetic) — mirrors torchvision ConvNeXt shapes
# ----------------------------------------------------------------------------
def init_params(key, in_chans=3, dims=(8, 16, 32, 64), depths=(1, 1, 1, 1),
                num_classes=10):
    keys = list(jax.random.split(key, 256))
    kit = iter(keys)
    dw_dtype = _depthwise_dtype()

    def nrm(shape, scale=0.02):
        return scale * jax.random.normal(next(kit), shape, jnp.float32)

    params = {}
    C0 = dims[0]
    # stem: Conv2d(in_chans, C0, k=4, s=4, bias=True) + LayerNorm2d
    w = nrm((C0, in_chans, 4, 4))                            # torch conv weight layout
    params['stem'] = dict(
        w=w.reshape(C0, in_chans * 16).T.astype(MATMUL_DTYPE),   # [in_chans*16, C0]
        b=jnp.zeros((1, C0), jnp.float32),
        g=jnp.ones((1, C0), jnp.float32),
        beta=jnp.zeros((1, C0), jnp.float32),
    )

    blocks, downs = [], []
    for si, C in enumerate(dims):
        stage = []
        for _ in range(depths[si]):
            dw = nrm((C, 1, 7, 7))                           # depthwise conv weight
            dww = jnp.transpose(dw[:, 0, :, :], (1, 2, 0)).reshape(49, C)
            w1 = nrm((4 * C, C))                             # Linear(C, 4C) torch layout
            w2 = nrm((C, 4 * C))                             # Linear(4C, C) torch layout
            stage.append(dict(
                dww=dww.astype(dw_dtype),                    # bf16 taps on v6e/v7x
                dwb=jnp.zeros((1, C), jnp.float32),
                g=jnp.ones((1, C), jnp.float32),
                beta=jnp.zeros((1, C), jnp.float32),
                w1=w1.T.astype(MATMUL_DTYPE),
                b1=jnp.zeros((1, 4 * C), jnp.float32),
                w2=w2.T.astype(MATMUL_DTYPE),
                b2=jnp.zeros((1, C), jnp.float32),
                ls=jnp.full((1, C), LAYER_SCALE, jnp.float32),
            ))
        blocks.append(stage)
        if si + 1 < len(dims):
            Cn = dims[si + 1]
            wd = nrm((Cn, C, 2, 2))                          # Conv2d(C, Cn, k=2, s=2)
            # [4*C, Cn] with row order (ky*2 + kx)*C + c (matches in-kernel tap concat)
            w_ds = jnp.transpose(wd, (2, 3, 1, 0)).reshape(4 * C, Cn)
            downs.append(dict(
                g=jnp.ones((1, C), jnp.float32),
                beta=jnp.zeros((1, C), jnp.float32),
                w=w_ds.astype(MATMUL_DTYPE),
                b=jnp.zeros((1, Cn), jnp.float32),
            ))
    params['blocks'] = blocks
    params['downs'] = downs

    CL = dims[-1]
    wh = nrm((num_classes, CL))
    params['head'] = dict(
        g=jnp.ones((1, CL), jnp.float32),
        beta=jnp.zeros((1, CL), jnp.float32),
        w=wh.T.astype(MATMUL_DTYPE),
        b=jnp.zeros((1, num_classes), jnp.float32),
    )
    return params


# ----------------------------------------------------------------------------
# forward pass
# ----------------------------------------------------------------------------
def convnext_forward(x, params, dims=(8, 16, 32, 64), num_classes=10):
    _maybe_probe_erf()

    B, Cin, H, W = x.shape
    C0 = dims[0]
    Ho, Wo = H // 4, W // 4

    # stem: patchify 4x4 stride-4 (glue reshape), matmul + LN fused in a row-tiled kernel
    sp = params['stem']
    patches = (x.reshape(B, Cin, Ho, 4, Wo, 4)
                .transpose(0, 2, 4, 1, 3, 5)
                .reshape(B * Ho * Wo, Cin * 16))
    h = rowtiled_call(linear_ln_kernel, patches,
                      (sp['w'], sp['b'], sp['g'], sp['beta']), C0, ACT_DTYPE)
    xhw = h.reshape(B, Ho, Wo, C0)                           # NHWC (bf16) from here on

    for si, C in enumerate(dims):
        for bp in params['blocks'][si]:
            xhw = cnblock_call(xhw, bp)                      # padding handled in-kernel
        if si + 1 < len(dims):
            xhw = downsample_call(xhw, params['downs'][si])  # LN + 2x2 conv, gather in-kernel

    # head: avgpool + LayerNorm + Linear (fused kernel)
    _, Hc, Wc, CL = xhw.shape
    logits = head_call(xhw.reshape(B, Hc * Wc, CL), params['head'], num_classes)
    return logits


if __name__ == "__main__":
    key = jax.random.PRNGKey(0)
    pkey, xkey = jax.random.split(key)

    dims = (8, 16, 32, 64)
    depths = (1, 1, 1, 1)
    num_classes = 10

    params = init_params(pkey, in_chans=3, dims=dims, depths=depths,
                         num_classes=num_classes)
    # input matches the PyTorch module's NCHW image convention
    x = jax.random.normal(xkey, (2, 3, 32, 32), jnp.float32)

    out = convnext_forward(x, params, dims=dims, num_classes=num_classes)
    jax.block_until_ready(out)
    assert out.shape == (2, num_classes) and out.dtype == jnp.float32
    print("KERNEL_OK")
</pallas_src>

<mosaic_0001>
module attributes {stable_mosaic.version = 11 : i64} {
  func.func @k(%arg0: memref<8x128xf32, #tpu.memory_space<vmem>>, %arg1: memref<8x128xf32, #tpu.memory_space<vmem>>) attributes {dimension_semantics = [], scalar_prefetch = 0 : i64, scratch_operands = 0 : i64, tpu.core_type = #tpu.core_type<tc>} {
    %c0 = arith.constant 0 : index
    %c0_0 = arith.constant 0 : index
    %0 = vector.load %arg0[%c0, %c0_0] : memref<8x128xf32, #tpu.memory_space<vmem>>, vector<8x128xf32>
    %1 = math.erf %0 : vector<8x128xf32>
    %c0_1 = arith.constant 0 : index
    %c0_2 = arith.constant 0 : index
    %2 = vector.load %arg1[%c0_1, %c0_2] : memref<8x128xf32, #tpu.memory_space<vmem>>, vector<8x128xf32>
    tpu.vector_store %arg1[%c0_1, %c0_2], %1 {strides = array<i32>} : memref<8x128xf32, #tpu.memory_space<vmem>>, vector<8x128xf32>,
    return
  }
}

module attributes {stable_mosaic.version = 11 : i64} {
  func.func @linear_ln_kernel(%arg0: i32, %arg1: memref<128x48xf32, #tpu.memory_space<vmem>>, %arg2: memref<48x8xbf16, #tpu.memory_space<vmem>>, %arg3: memref<1x8xf32, #tpu.memory_space<vmem>>, %arg4: memref<1x8xf32, #tpu.memory_space<vmem>>, %arg5: memref<1x8xf32, #tpu.memory_space<vmem>>, %arg6: memref<128x8xbf16, #tpu.memory_space<vmem>>) attributes {dimension_semantics = [#tpu.dimension_semantics<parallel>], iteration_bounds = array<i64: 1>, scalar_prefetch = 0 : i64, scratch_operands = 0 : i64, tpu.core_type = #tpu.core_type<tc>, window_params = [{transform_indices = @transform_0, window_bounds = array<i64: 128, 48>}, {pipeline_mode = #tpu.pipeline_mode<synchronous>, transform_indices = @transform_1, window_bounds = array<i64: 48, 8>}, {pipeline_mode = #tpu.pipeline_mode<synchronous>, transform_indices = @transform_2, window_bounds = array<i64: 1, 8>}, {pipeline_mode = #tpu.pipeline_mode<synchronous>, transform_indices = @transform_3, window_bounds = array<i64: 1, 8>}, {pipeline_mode = #tpu.pipeline_mode<synchronous>, transform_indices = @transform_4, window_bounds = array<i64: 1, 8>}, {transform_indices = @transform_5, window_bounds = array<i64: 128, 8>}]} {
    %c0 = arith.constant 0 : index
    %c0_0 = arith.constant 0 : index
    %0 = vector.load %arg1[%c0, %c0_0] : memref<128x48xf32, #tpu.memory_space<vmem>>, vector<128x48xf32>
    %1 = arith.truncf %0 : vector<128x48xf32> to vector<128x48xbf16>
    %c0_1 = arith.constant 0 : index
    %c0_2 = arith.constant 0 : index
    %2 = vector.load %arg2[%c0_1, %c0_2] : memref<48x8xbf16, #tpu.memory_space<vmem>>, vector<48x8xbf16>
    %cst = arith.constant dense<0.000000e+00> : vector<128x8xf32>
    %3 = tpu.matmul %1, %2, %cst {dimension_numbers = #tpu.dot_dimension_numbers<[1], [0], [0], [1], [0, 0, 1, 1], [], []>} : vector<128x48xbf16>, vector<48x8xbf16>, vector<128x8xf32> -> vector<128x8xf32>
    %c0_3 = arith.constant 0 : index
    %c0_4 = arith.constant 0 : index
    %4 = vector.load %arg3[%c0_3, %c0_4] : memref<1x8xf32, #tpu.memory_space<vmem>>, vector<1x8xf32>
    %5 = vector.broadcast %4 : vector<1x8xf32> to vector<128x8xf32>
    %6 = arith.addf %3, %5 : vector<128x8xf32>
    %c0_5 = arith.constant 0 : index
    %c0_6 = arith.constant 0 : index
    %7 = vector.load %arg4[%c0_5, %c0_6] : memref<1x8xf32, #tpu.memory_space<vmem>>, vector<1x8xf32>
    %c0_7 = arith.constant 0 : index
    %c0_8 = arith.constant 0 : index
    %8 = vector.load %arg5[%c0_7, %c0_8] : memref<1x8xf32, #tpu.memory_space<vmem>>, vector<1x8xf32>
    %cst_9 = arith.constant dense<0.000000e+00> : vector<128xf32>
    %9 = vector.multi_reduction <add>, %6, %cst_9 [1] : vector<128x8xf32> to vector<128xf32>
    %10 = vector.shape_cast %9 : vector<128xf32> to vector<128x1xf32>
    %cst_10 = arith.constant 8.000000e+00 : f32
    %11 = vector.broadcast %cst_10 : f32 to vector<128x1xf32>
    %12 = arith.divf %10, %11 : vector<128x1xf32>
    %13 = arith.mulf %6, %6 : vector<128x8xf32>
    %cst_11 = arith.constant dense<0.000000e+00> : vector<128xf32>
    %14 = vector.multi_reduction <add>, %13, %cst_11 [1] : vector<128x8xf32> to vector<128xf32>
    %15 = vector.shape_cast %14 : vector<128xf32> to vector<128x1xf32>
    %cst_12 = arith.constant 8.000000e+00 : f32
    %16 = vector.broadcast %cst_12 : f32 to vector<128x1xf32>
    %17 = arith.divf %15, %16 : vector<128x1xf32>
    %18 = arith.mulf %12, %12 : vector<128x1xf32>
    %19 = arith.subf %17, %18 : vector<128x1xf32>
    %cst_13 = arith.constant 0.000000e+00 : f32
    %20 = vector.broadcast %cst_13 : f32 to vector<128x1xf32>
    %21 = arith.maximumf %19, %20 : vector<128x1xf32>
    %22 = vector.broadcast %12 : vector<128x1xf32> to vector<128x8xf32>
    %23 = arith.subf %6, %22 : vector<128x8xf32>
    %cst_14 = arith.constant 9.99999997E-7 : f32
    %24 = vector.broadcast %cst_14 : f32 to vector<128x1xf32>
    %25 = arith.addf %21, %24 : vector<128x1xf32>
    %26 = math.rsqrt %25 : vector<128x1xf32>
    %27 = vector.broadcast %26 : vector<128x1xf32> to vector<128x8xf32>
    %28 = arith.mulf %23, %27 : vector<128x8xf32>
    %29 = vector.broadcast %7 : vector<1x8xf32> to vector<128x8xf32>
    %30 = arith.mulf %28, %29 : vector<128x8xf32>
    %31 = vector.broadcast %8 : vector<1x8xf32> to vector<128x8xf32>
    %32 = arith.addf %30, %31 : vector<128x8xf32>
    %33 = arith.truncf %32 : vector<128x8xf32> to vector<128x8xbf16>
    %c0_15 = arith.constant 0 : index
    %c0_16 = arith.constant 0 : index
    %34 = vector.load %arg6[%c0_15, %c0_16] : memref<128x8xbf16, #tpu.memory_space<vmem>>, vector<128x8xbf16>
    tpu.vector_store %arg6[%c0_15, %c0_16], %33 {strides = array<i32>} : memref<128x8xbf16, #tpu.memory_space<vmem>>, vector<128x8xbf16>,
    return
  }
  func.func @transform_0(%arg0: i32) -> (i32, i32) {
    %c0_i32 = arith.constant 0 : i32
    %c0_i32_0 = arith.constant 0 : i32
    return %arg0, %c0_i32 : i32, i32
  }
  func.func @transform_1(%arg0: i32) -> (i32, i32) {
    %c0_i32 = arith.constant 0 : i32
    %c0_i32_0 = arith.constant 0 : i32
    %c0_i32_1 = arith.constant 0 : i32
    return %c0_i32, %c0_i32_0 : i32, i32
  }
  func.func @transform_2(%arg0: i32) -> (i32, i32) {
    %c0_i32 = arith.constant 0 : i32
    %c0_i32_0 = arith.constant 0 : i32
    %c0_i32_1 = arith.constant 0 : i32
    return %c0_i32, %c0_i32_0 : i32, i32
  }
  func.func @transform_3(%arg0: i32) -> (i32, i32) {
    %c0_i32 = arith.constant 0 : i32
    %c0_i32_0 = arith.constant 0 : i32
    %c0_i32_1 = arith.constant 0 : i32
    return %c0_i32, %c0_i32_0 : i32, i32
  }
  func.func @transform_4(%arg0: i32) -> (i32, i32) {
    %c0_i32 = arith.constant 0 : i32
    %c0_i32_0 = arith.constant 0 : i32
    %c0_i32_1 = arith.constant 0 : i32
    return %c0_i32, %c0_i32_0 : i32, i32
  }
  func.func @transform_5(%arg0: i32) -> (i32, i32) {
    %c0_i32 = arith.constant 0 : i32
    %c0_i32_0 = arith.constant 0 : i32
    return %arg0, %c0_i32 : i32, i32
  }
}

</mosaic_0001>

<bundles_post_ra>
// kernel: tpu_custom_call.1
= control target key start
LH: loop header
LB: loop body
LE: loop exit
PB: predicated region body
PF: predicated region fallthrough
CT: control target
= control target key end

     0   :  { %6 = vsyncpa [#allocation3], 0  ;;  %s157_s0 = inlined_call_operand.hbm [shape: f32[8,128], index: 0, kind: input, shape index: {}]   ;;  %s158_s1 = inlined_call_operand.hbm [shape: f32[8,128], index: 1, kind: output, shape index: {}]  }
   0x1   :  { %7 = vsyncpa [#allocation4], 0  ;;  %s13_s8 = sshll.u32 %s157_s0, 4  ;;  %s139_s9 = smov [#allocation2]   ;;  %s14_s8 = int_to_ptr.hbm [resolvable:$true] %s13_s8 }
   0x2   :  { %s15_s10 = sshll.u32 %s139_s9, 4  ;;  %s16_s10 = int_to_ptr.vmem [resolvable:$true] %s15_s10 }
   0x3   :  { %18 = dma.hbm_to_vmem [thread:$0]  %s14_s8, 128, %s16_s10, [#allocation3]  }
   0x4   :  { %135 = dma.done.wait [#allocation3], 128  }
   0x5   :  { %136 = vsyncadd [#allocation3], 4294967168  ;;  %v23_v0 = vld [vmem:[#allocation2] sm:$0xff]  ;;  %s140_s0 = smov [#allocation5]   ;;  %s72_s14 = sshll.u32 %s158_s1, 4  ;;  %s73_s14 = int_to_ptr.hbm [resolvable:$true] %s72_s14 }
   0x6   :  { %v24_v1 = vmul.f32 %v23_v0, %v23_v0  ;;  %s70_s11 = sshll.u32 %s140_s0, 4  ;;  %s71_s11 = int_to_ptr.vmem [resolvable:$true] %s70_s11 }
   0x8   :  { %v25_v2 = vmin.f32 %v24_v1, 16.0 }
   0xa   :  { %v26_v3 = vmul.f32 2.1237322e-06, %v25_v2  ;;  %v37_v4 = vmul.f32 3.8918573e-05, %v25_v2 }
   0xc   :  { %v27_v5 = vadd.f32 0.00028619796, %v26_v3  ;;  %v38_v6 = vadd.f32 0.001143296, %v37_v4 }
   0xe   :  { %v28_v7 = vmul.f32 %v27_v5, %v25_v2  ;;  %v39_v8 = vmul.f32 %v38_v6, %v25_v2 }
  0x10   :  { %v29_v9 = vadd.f32 0.0036580483, %v28_v7  ;;  %v40_v10 = vadd.f32 0.014752088, %v39_v8 }
  0x12   :  { %v30_v11 = vmul.f32 %v29_v9, %v25_v2  ;;  %v41_v12 = vmul.f32 %v40_v10, %v25_v2 }
  0x14   :  { %v42_v13 = vadd.f32 0.112945676, %v41_v12  ;;  %v31_v14 = vadd.f32 0.05243302, %v30_v11 }
  0x16   :  { %v43_v15 = vmul.f32 %v42_v13, %v25_v2  ;;  %v32_v17 = vmul.f32 %v31_v14, %v25_v2 }
  0x18   :  { %v44_v16 = vadd.f32 0.4994258, %v43_v15  ;;  %v33_v20 = vadd.f32 0.18741608, %v32_v17 }
  0x1a   :  { %v45_v18 = vmul.f32 %v44_v16, %v25_v2  ;;  %v34_v21 = vmul.f32 %v33_v20, %v25_v2 }
  0x1c   :  { %v46_v19 = vadd.f32 1.0, %v45_v18  ;;  %v35_v24 = vadd.f32 1.1283791, %v34_v21 }
  0x1e   :  { %85 = vrcp.f32 %v46_v19  ;;  %v58_v25 = vand.u32 2147483648, %v46_v19  ;;  %vm52_vm0 = vweird.f32 %v46_v19  ;;  %v56_v27 = vand.u32 2147483647, %v46_v19 }
  0x1f   :  { %v36_v30 = vmul.f32 %v35_v24, %v23_v0 }
  0x20   :  { %v59_v29 = vor.u32 1.1754944e-38, %v58_v25  ;;  %vm57_vm3 = vcmp.eq.f32.partialorder %v56_v27, 8.507059e+37 }
  0x24   :  { %v86_v22 = vpop.eup %85 }
  0x25   :  { %v48_v23 = vmul.f32 %v86_v22, %v46_v19  ;;  %vm53_vm1 = vweird.f32 %v86_v22 }
  0x26   :  { %vm54_vm2 = vmor %vm52_vm0, %vm53_vm1 }
  0x27   :  { %v49_v26 = vsub.f32 1.0, %v48_v23 }
  0x29   :  { %v50_v28 = vmul.f32 %v86_v22, %v49_v26 }
  0x2b   :  { %v51_v31 = vadd.f32 %v86_v22, %v50_v28 }
  0x2d   :  { %v55_v32 = vsel %vm54_vm2, %v86_v22, %v51_v31 }
  0x2e   :  { %v60_v33 = vsel %vm57_vm3, %v59_v29, %v55_v32 }
  0x2f   :  { %v61_v34 = vmul.f32 %v60_v33, %v36_v30 }
  0x31   :  { %v82_v35 = vclamps-f32 %v61_v34, 1.0 }
  0x33   :  { %64 = vst [vmem:[#allocation5] sm:$0xff] %v82_v35 }
  0x34   :  { %75 = dma.vmem_to_hbm [thread:$0]  %s71_s11, 128, %s73_s14, [#allocation4]  }
  0x35   :  { %137 = dma.done.wait [#allocation4], 128  }
  0x36   :  { %138 = vsyncadd [#allocation4], 4294967168 }
  0x37   :  { %80 = vsyncpa [#allocation3], 1 }
  0x38   :  { %81 = vsyncpa [#allocation4], 1 }

// kernel: tpu_custom_call.1
= control target key start
LH: loop header
LB: loop body
LE: loop exit
PB: predicated region body
PF: predicated region fallthrough
CT: control target
= control target key end

     0   :  { %vm73_vm0 = vcmask 392192   ;;  %vm149_vm1 = vcmask 64512   ;;  %vm611_vm6 = vcmask 60416   ;;  %s1243_s1 = inlined_call_operand.vmem [shape: bf16[48,8], index: 1, kind: input, shape index: {}]   ;;  %s1244_s0 = inlined_call_operand.vmem [shape: f32[128,48], index: 0, kind: input, shape index: {}]   ;;  %s1245_s2 = inlined_call_operand.vmem [shape: f32[1,8], index: 2, kind: input, shape index: {}]   ;;  %s1246_s3 = inlined_call_operand.vmem [shape: f32[1,8], index: 3, kind: input, shape index: {}]   ;;  %s1247_s4 = inlined_call_operand.vmem [shape: f32[1,8], index: 4, kind: input, shape index: {}]   ;;  %s1248_s5 = inlined_call_operand.vmem [shape: bf16[128,8], index: 5, kind: output, shape index: {}]  }
   0x1   :  { %v654_v0 = vld [vmem:[%s1243_s1 + $0x10] sm:$0xff]  ;;  %v653_v1 = vld [vmem:[%s1243_s1 + $0x8] sm:$0xff]  ;;  %v652_v2 = vld [vmem:[%s1243_s1] sm:$0xff] }
   0x2   :  { %103 = vmatpush.bf16.msra.mxu0 %v654_v0  ;;  %655 = vmatpush.bf16.msra.mxu1 %v654_v0  ;;  %v21_v3 = vld [vmem:[%s1244_s0] sm:$0xff]  ;;  %v22_v4 = vld [vmem:[%s1244_s0 + $0x8] sm:$0xff]  ;;  %v23_v15 = vld [vmem:[%s1244_s0 + $0x10] sm:$0xff] }
   0x3   :  { %657 = vmatpush.bf16.msra.mxu3 %v654_v0  ;;  %656 = vmatpush.bf16.msra.mxu2 %v654_v0  ;;  %v25_v5 = vld [vmem:[%s1244_s0 + $0x20] sm:$0xff]  ;;  %v26_v6 = vld [vmem:[%s1244_s0 + $0x28] sm:$0xff]  ;;  %v37_v11 = vpack.c.bf16 %v22_v4, %v21_v3  ;;  %v24_v16 = vld [vmem:[%s1244_s0 + $0x18] sm:$0xff] }
   0x4   :  { %v33_v7 = vld [vmem:[%s1244_s0 + $0x60] sm:$0xff]  ;;  %v34_v8 = vld [vmem:[%s1244_s0 + $0x68] sm:$0xff]  ;;  %v39_v12 = vpack.c.bf16 %v26_v6, %v25_v5  ;;  %v27_v17 = vld [vmem:[%s1244_s0 + $0x30] sm:$0xff]  ;;  %v38_v23 = vpack.c.bf16 %v24_v16, %v23_v15 }
   0x5   :  { %v29_v9 = vld [vmem:[%s1244_s0 + $0x40] sm:$0xff]  ;;  %v30_v10 = vld [vmem:[%s1244_s0 + $0x48] sm:$0xff]  ;;  %v43_v13 = vpack.c.bf16 %v34_v8, %v33_v7  ;;  %v28_v18 = vld [vmem:[%s1244_s0 + $0x38] sm:$0xff] }
   0x6   :  { %104 = vmatpush.bf16.msra.mxu0 %v653_v1  ;;  %658 = vmatpush.bf16.msra.mxu1 %v653_v1  ;;  %v41_v14 = vpack.c.bf16 %v30_v10, %v29_v9  ;;  %v35_v19 = vld [vmem:[%s1244_s0 + $0x70] sm:$0xff]  ;;  %v36_v20 = vld [vmem:[%s1244_s0 + $0x78] sm:$0xff]  ;;  %v40_v24 = vpack.c.bf16 %v28_v18, %v27_v17  ;;  %v801_v27 = vld [vmem:[%s1245_s2] ss:$0 sm:$0xff] }
   0x7   :  { %660 = vmatpush.bf16.msra.mxu3 %v653_v1  ;;  %659 = vmatpush.bf16.msra.mxu2 %v653_v1  ;;  %v31_v21 = vld [vmem:[%s1244_s0 + $0x50] sm:$0xff]  ;;  %v32_v22 = vld [vmem:[%s1244_s0 + $0x58] sm:$0xff]  ;;  %v44_v25 = vpack.c.bf16 %v36_v20, %v35_v19 }
   0x8   :  { %v42_v26 = vpack.c.bf16 %v32_v22, %v31_v21 }
   0xa   :  { %105 = vmatpush.bf16.msra.mxu0 %v652_v2  ;;  %661 = vmatpush.bf16.msra.mxu1 %v652_v2 }
   0xb   :  { %663 = vmatpush.bf16.msra.mxu3 %v652_v2  ;;  %662 = vmatpush.bf16.msra.mxu2 %v652_v2 }
   0xd   :  { %644 = vmatmul.msk.bf16.vlgmr.msra.gmra.mxu0 %vm73_vm0, %v37_v11  ;;  %646 = vmatmul.msk.bf16.vlgmr.msra.gmra.mxu1 %vm73_vm0, %v39_v12 }
   0xe   :  { %650 = vmatmul.msk.bf16.vlgmr.msra.gmra.mxu3 %vm73_vm0, %v43_v13  ;;  %648 = vmatmul.msk.bf16.vlgmr.msra.gmra.mxu2 %vm73_vm0, %v41_v14 }
  0x1d   :  { %645 = vmatmul.msk.bf16.gmra.mxu0 %vm73_vm0, %v38_v23  ;;  %647 = vmatmul.msk.bf16.gmra.mxu1 %vm73_vm0, %v40_v24 }
  0x1e   :  { %651 = vmatmul.msk.bf16.gmra.mxu3 %vm73_vm0, %v44_v25  ;;  %649 = vmatmul.msk.bf16.gmra.mxu2 %vm73_vm0, %v42_v26 }
  0x8a   :  { %v107_v28 = vpop.f32.mrf.mxu0  ;;  %v117_v29 = vpop.f32.mrf.mxu1 }
  0x8b   :  { %v804_v30 = vadd.f32 %v801_v27, %v107_v28  ;;  %v807_v31 = vadd.f32 %v801_v27, %v117_v29 }
  0x8d   :  { %v162_v32 = vsel %vm149_vm1, %v807_v31, 0.0  ;;  %v150_v33 = vsel %vm149_vm1, %v804_v30, 0.0  ;;  %v221_v34 = vmul.f32 %v804_v30, %v804_v30  ;;  %v225_v36 = vmul.f32 %v807_v31, %v807_v31 }
  0x8e   :  { %163 = vadd.xlane.f32.xlu2 %v162_v32  ;;  %151 = vadd.xlane.f32.xlu0 %v150_v33 }
  0x8f   :  { %v237_v35 = vsel %vm149_vm1, %v221_v34, 0.0  ;;  %v249_v39 = vsel %vm149_vm1, %v225_v36, 0.0 }
  0x90   :  { %238 = vadd.xlane.f32.xlu1 %v237_v35 }
  0x91   :  { %v137_v37 = vpop.f32.mrf.mxu3  ;;  %v127_v42 = vpop.f32.mrf.mxu2 }
  0x92   :  { %v819_v38 = vadd.f32 %v801_v27, %v137_v37  ;;  %v109_v43 = vpop.f32.mrf.mxu0  ;;  %v828_v45 = vadd.f32 %v801_v27, %v127_v42  ;;  %v119_v51 = vpop.f32.mrf.mxu1 }
  0x93   :  { %v831_v46 = vadd.f32 %v801_v27, %v109_v43  ;;  %v845_v55 = vadd.f32 %v801_v27, %v119_v51 }
  0x94   :  { %v186_v40 = vsel %vm149_vm1, %v819_v38, 0.0  ;;  %v233_v41 = vmul.f32 %v819_v38, %v819_v38  ;;  %v174_v49 = vsel %vm149_vm1, %v828_v45, 0.0  ;;  %v229_v53 = vmul.f32 %v828_v45, %v828_v45 }
  0x95   :  { %v153_v50 = vsel %vm149_vm1, %v831_v46, 0.0  ;;  %v165_v59 = vsel %vm149_vm1, %v845_v55, 0.0  ;;  %v222_v62 = vmul.f32 %v831_v46, %v831_v46  ;;  %v226_v63 = vmul.f32 %v845_v55, %v845_v55 }
  0x96   :  { %250 = vadd.xlane.f32.xlu2 %v249_v39  ;;  %187 = vadd.xlane.f32.xlu0 %v186_v40  ;;  %v273_v44 = vsel %vm149_vm1, %v233_v41, 0.0  ;;  %v261_v57 = vsel %vm149_vm1, %v229_v53, 0.0 }
  0x97   :  { %v240_v4 = vsel %vm149_vm1, %v222_v62, 0.0  ;;  %v252_v5 = vsel %vm149_vm1, %v226_v63, 0.0 }
  0x98   :  { %274 = vadd.xlane.f32.xlu1 %v273_v44 }
  0x99   :  { %v139_v47 = vpop.f32.mrf.mxu3  ;;  %v129_v58 = vpop.f32.mrf.mxu2 }
  0x9a   :  { %v834_v48 = vadd.f32 %v801_v27, %v139_v47  ;;  %v112_v54 = vpop.f32.mrf.mxu0  ;;  %v856_v61 = vadd.f32 %v801_v27, %v129_v58  ;;  %v122_v1 = vpop.f32.mrf.mxu1 }
  0x9b   :  { %v848_v56 = vadd.f32 %v801_v27, %v112_v54  ;;  %v865_v3 = vadd.f32 %v801_v27, %v122_v1 }
  0x9c   :  { %v189_v52 = vsel %vm149_vm1, %v834_v48, 0.0  ;;  %v230_v0 = vmul.f32 %v856_v61, %v856_v61  ;;  %v177_v12 = vsel %vm149_vm1, %v856_v61, 0.0  ;;  %v234_v37 = vmul.f32 %v834_v48, %v834_v48 }
  0x9d   :  { %v156_v60 = vsel %vm149_vm1, %v848_v56, 0.0  ;;  %v227_v8 = vmul.f32 %v865_v3, %v865_v3  ;;  %v168_v18 = vsel %vm149_vm1, %v865_v3, 0.0  ;;  %v223_v22 = vmul.f32 %v848_v56, %v848_v56 }
  0x9e   :  { %175 = vadd.xlane.f32.xlu2 %v174_v49  ;;  %154 = vadd.xlane.f32.xlu0 %v153_v50  ;;  %v264_v6 = vsel %vm149_vm1, %v230_v0, 0.0  ;;  %v276_v40 = vsel %vm149_vm1, %v234_v37, 0.0  ;;  %v702_v50 = vmov 8.0  }
  0x9f   :  { %v255_v13 = vsel %vm149_vm1, %v227_v8, 0.0  ;;  %v243_v25 = vsel %vm149_vm1, %v223_v22, 0.0  ;;  %668 = vrcp.f32 %v702_v50 }
  0xa0   :  { %190 = vadd.xlane.f32.xlu1 %v189_v52 }
  0xa1   :  { %v142_v2 = vpop.f32.mrf.mxu3  ;;  %v132_v9 = vpop.f32.mrf.mxu2 }
  0xa2   :  { %v871_v7 = vadd.f32 %v801_v27, %v142_v2  ;;  %v876_v10 = vadd.f32 %v801_v27, %v132_v9  ;;  %v124_v15 = vpop.f32.mrf.mxu1  ;;  %v114_v20 = vpop.f32.mrf.mxu0 }
  0xa3   :  { %v887_v17 = vadd.f32 %v801_v27, %v124_v15  ;;  %v898_v23 = vadd.f32 %v801_v27, %v114_v20 }
  0xa4   :  { %v192_v11 = vsel %vm149_vm1, %v871_v7, 0.0  ;;  %v231_v14 = vmul.f32 %v876_v10, %v876_v10  ;;  %v180_v19 = vsel %vm149_vm1, %v876_v10, 0.0  ;;  %v235_v43 = vmul.f32 %v871_v7, %v871_v7 }
  0xa5   :  { %v228_v21 = vmul.f32 %v887_v17, %v887_v17  ;;  %v159_v29 = vsel %vm149_vm1, %v898_v23, 0.0  ;;  %v171_v36 = vsel %vm149_vm1, %v887_v17, 0.0  ;;  %v669_v51 = vpop.eup %668 }
  0xa6   :  { %166 = vadd.xlane.f32.xlu2 %v165_v59  ;;  %262 = vadd.xlane.f32.xlu0 %v261_v57  ;;  %v267_v16 = vsel %vm149_vm1, %v231_v14, 0.0  ;;  %v279_v47 = vsel %vm149_vm1, %v235_v43, 0.0  ;;  %v199_v52 = vmul.f32 8.0, %v669_v51  ;;  %vm203_vm2 = vweird.f32 %v669_v51 }
  0xa7   :  { %v258_v24 = vsel %vm149_vm1, %v228_v21, 0.0 }
  0xa8   :  { %157 = vadd.xlane.f32.xlu1 %v156_v60  ;;  %v200_v53 = vsub.f32 1.0, %v199_v52 }
  0xa9   :  { %v134_v26 = vpop.f32.mrf.mxu2  ;;  %v144_v28 = vpop.f32.mrf.mxu3 }
  0xaa   :  { %v905_v32 = vadd.f32 %v801_v27, %v134_v26  ;;  %v908_v33 = vadd.f32 %v801_v27, %v144_v28  ;;  %v224_v27 = vmul.f32 %v898_v23, %v898_v23  ;;  %v201_v54 = vmul.f32 %v669_v51, %v200_v53 }
  0xac   :  { %v183_v34 = vsel %vm149_vm1, %v905_v32, 0.0  ;;  %v195_v35 = vsel %vm149_vm1, %v908_v33, 0.0  ;;  %v232_v39 = vmul.f32 %v905_v32, %v905_v32  ;;  %v246_v42 = vsel %vm149_vm1, %v224_v27, 0.0 }
  0xad   :  { %v236_v44 = vmul.f32 %v908_v33, %v908_v33  ;;  %v202_v57 = vadd.f32 %v669_v51, %v201_v54 }
  0xae   :  { %241 = vadd.xlane.f32.xlu2 %v240_v4  ;;  %253 = vadd.xlane.f32.xlu0 %v252_v5  ;;  %v270_v41 = vsel %vm149_vm1, %v232_v39, 0.0 }
  0xaf   :  { %v282_v49 = vsel %vm149_vm1, %v236_v44, 0.0  ;;  %v931_v58 = vsel %vm203_vm2, %v669_v51, %v202_v57 }
  0xb0   :  { %265 = vadd.xlane.f32.xlu1 %v264_v6 }
  0xb6   :  { %193 = vadd.xlane.f32.xlu2 %v192_v11  ;;  %178 = vadd.xlane.f32.xlu0 %v177_v12 }
  0xb8   :  { %256 = vadd.xlane.f32.xlu1 %v255_v13 }
  0xbe   :  { %268 = vadd.xlane.f32.xlu2 %v267_v16  ;;  %169 = vadd.xlane.f32.xlu0 %v168_v18 }
  0xc0   :  { %181 = vadd.xlane.f32.xlu1 %v180_v19 }
  0xc6   :  { %259 = vadd.xlane.f32.xlu2 %v258_v24  ;;  %244 = vadd.xlane.f32.xlu0 %v243_v25 }
  0xc8   :  { %160 = vadd.xlane.f32.xlu1 %v159_v29 }
  0xce   :  { %184 = vadd.xlane.f32.xlu2 %v183_v34  ;;  %196 = vadd.xlane.f32.xlu0 %v195_v35 }
  0xd0   :  { %172 = vadd.xlane.f32.xlu1 %v171_v36 }
  0xd6   :  { %277 = vadd.xlane.f32.xlu2 %v276_v40  ;;  %271 = vadd.xlane.f32.xlu0 %v270_v41 }
  0xd8   :  { %247 = vadd.xlane.f32.xlu1 %v246_v42 }
  0xde   :  { %280 = vadd.xlane.f32.xlu0 %v279_v47 }
  0xe0   :  { %283 = vadd.xlane.f32.xlu1 %v282_v49 }
 0x101   :  { %v164_v59 = vpop.xlane.xlu2 %163  ;;  %v152_v60 = vpop.xlane.xlu0 %151 }
 0x102   :  { %v205_v62 = vmul.f32 %v931_v58, %v152_v60  ;;  %v936_v2 = vmul.f32 %v931_v58, %v164_v59  ;;  %v964_v59 = vld [vmem:[%s1246_s3] ss:$0 sm:$0xff] }
 0x103   :  { %v239_v63 = vpop.xlane.xlu1 %238 }
 0x104   :  { %v301_v0 = vmul.f32 %v205_v62, %v205_v62  ;;  %v285_v1 = vmul.f32 %v239_v63, %v931_v58  ;;  %v305_v5 = vmul.f32 %v936_v2, %v936_v2  ;;  %v349_v57 = vsub.f32 %v804_v30, %v205_v62 }
 0x106   :  { %v317_v4 = vsub.f32 %v285_v1, %v301_v0 }
 0x108   :  { %v333_v6 = vmax.f32 %v317_v4, 0.0 }
 0x109   :  { %v251_v8 = vpop.xlane.xlu2 %250  ;;  %v188_v9 = vpop.xlane.xlu0 %187 }
 0x10a   :  { %v289_v11 = vmul.f32 %v251_v8, %v931_v58  ;;  %v942_v12 = vmul.f32 %v931_v58, %v188_v9  ;;  %v365_v13 = vadd.f32 1e-06, %v333_v6  ;;  %v353_v8 = vsub.f32 %v807_v31, %v936_v2 }
 0x10b   :  { %v275_v14 = vpop.xlane.xlu1 %274 }
 0x10c   :  { %v321_v15 = vsub.f32 %v289_v11, %v305_v5  ;;  %v313_v16 = vmul.f32 %v942_v12, %v942_v12  ;;  %v297_v18 = vmul.f32 %v275_v14, %v931_v58  ;;  %670 = vrsqrt.f32 %v365_v13  ;;  %v972_v5 = vld [vmem:[%s1247_s4] ss:$0 sm:$0xff] }
 0x10d   :  { %vm387_vm4 = vweird.f32 %v365_v13 }
 0x10e   :  { %v337_v19 = vmax.f32 %v321_v15, 0.0  ;;  %v329_v20 = vsub.f32 %v297_v18, %v313_v16 }
 0x110   :  { %v369_v21 = vadd.f32 1e-06, %v337_v19  ;;  %v345_v22 = vmax.f32 %v329_v20, 0.0 }
 0x111   :  { %v176_v24 = vpop.xlane.xlu2 %175  ;;  %v155_v25 = vpop.xlane.xlu0 %154 }
 0x112   :  { %672 = vrsqrt.f32 %v369_v21  ;;  %v377_v26 = vadd.f32 1e-06, %v345_v22  ;;  %v671_v28 = vpop.eup %670  ;;  %v950_v36 = vmul.f32 %v931_v58, %v176_v24  ;;  %v958_v53 = vmul.f32 %v931_v58, %v155_v25 }
 0x113   :  { %v947_v29 = vpop.xlane.xlu1 %190  ;;  %v382_v34 = vmul.f32 %v671_v28, %v365_v13  ;;  %vm388_vm3 = vweird.f32 %v671_v28  ;;  %vm427_vm8 = vweird.f32 %v369_v21 }
 0x114   :  { %674 = vrsqrt.f32 %v377_v26  ;;  %v309_v27 = vmul.f32 %v950_v36, %v950_v36  ;;  %vm389_vm5 = vmor %vm387_vm4, %vm388_vm3  ;;  %v302_v9 = vmul.f32 %v958_v53, %v958_v53  ;;  %vm507_vm11 = vweird.f32 %v377_v26 }
 0x115   :  { %v383_v35 = vmul.f32 %v671_v28, %v382_v34 }
 0x117   :  { %v384_v39 = vmul.f32 0.5, %v383_v35 }
 0x118   :  { %v673_v37 = vpop.eup %672 }
 0x119   :  { %v422_v40 = vmul.f32 %v673_v37, %v369_v21  ;;  %v167_v41 = vpop.xlane.xlu2 %166  ;;  %v263_v42 = vpop.xlane.xlu0 %262  ;;  %v385_v44 = vsub.f32 1.5, %v384_v39  ;;  %vm428_vm7 = vweird.f32 %v673_v37 }
 0x11a   :  { %v675_v43 = vpop.eup %674  ;;  %v293_v47 = vmul.f32 %v263_v42, %v931_v58  ;;  %v967_v1 = vmul.f32 %v931_v58, %v167_v41  ;;  %vm429_vm10 = vmor %vm427_vm8, %vm428_vm7 }
 0x11b   :  { %v423_v49 = vmul.f32 %v673_v37, %v422_v40  ;;  %v502_v50 = vmul.f32 %v675_v43, %v377_v26  ;;  %v955_v51 = vpop.xlane.xlu1 %157  ;;  %v386_v52 = vmul.f32 %v671_v28, %v385_v44  ;;  %vm508_vm9 = vweird.f32 %v675_v43 }
 0x11c   :  { %v325_v54 = vsub.f32 %v293_v47, %v309_v27  ;;  %v306_v19 = vmul.f32 %v967_v1, %v967_v1  ;;  %vm509_vm12 = vmor %vm507_vm11, %vm508_vm9 }
 0x11d   :  { %v424_v60 = vmul.f32 0.5, %v423_v49  ;;  %v503_v63 = vmul.f32 %v675_v43, %v502_v50  ;;  %v390_v0 = vsel %vm389_vm5, %v671_v28, %v386_v52  ;;  %v361_v28 = vsub.f32 %v819_v38, %v942_v12 }
 0x11e   :  { %v341_v4 = vmax.f32 %v325_v54, 0.0  ;;  %v541_v30 = vmul.f32 %v390_v0, %v349_v57 }
 0x11f   :  { %v425_v62 = vsub.f32 1.5, %v424_v60  ;;  %v504_v6 = vmul.f32 0.5, %v503_v63 }
 0x120   :  { %v373_v11 = vadd.f32 1e-06, %v341_v4  ;;  %v560_v13 = vmul.f32 %v964_v59, %v541_v30 }
 0x121   :  { %v426_v14 = vmul.f32 %v673_v37, %v425_v62  ;;  %v505_v15 = vsub.f32 1.5, %v504_v6  ;;  %v242_v16 = vpop.xlane.xlu2 %241  ;;  %v254_v18 = vpop.xlane.xlu0 %253 }
 0x122   :  { %676 = vrsqrt.f32 %v373_v11  ;;  %v286_v20 = vmul.f32 %v242_v16, %v931_v58  ;;  %v290_v31 = vmul.f32 %v254_v18, %v931_v58  ;;  %v579_v2 = vadd.f32 %v972_v5, %v560_v13 }
 0x123   :  { %v430_v21 = vsel %vm429_vm10, %v673_v37, %v426_v14  ;;  %v506_v22 = vmul.f32 %v675_v43, %v505_v15  ;;  %v266_v24 = vpop.xlane.xlu1 %265  ;;  %vm467_vm14 = vweird.f32 %v373_v11 }
 0x124   :  { %v545_v25 = vmul.f32 %v430_v21, %v353_v8  ;;  %v318_v34 = vsub.f32 %v286_v20, %v302_v9  ;;  %v322_v35 = vsub.f32 %v290_v31, %v306_v19  ;;  %v595_v39 = vpack.c.bf16 %v579_v2, %v579_v2 }
 0x125   :  { %v510_v27 = vsel %vm509_vm12, %v675_v43, %v506_v22  ;;  %v294_v30 = vmul.f32 %v266_v24, %v931_v58  ;;  %v357_v19 = vsub.f32 %v828_v45, %v950_v36  ;;  %v1023_v21 = vmul.f32 %v931_v58, %v955_v51 }
 0x126   :  { %v564_v40 = vmul.f32 %v964_v59, %v545_v25  ;;  %v553_v41 = vmul.f32 %v510_v27, %v361_v28  ;;  %v334_v42 = vmax.f32 %v318_v34, 0.0  ;;  %v338_v44 = vmax.f32 %v322_v35, 0.0  ;;  %612 = vst.msk [vmem:[%s1248_s5] sm:$0xf] %vm611_vm6, %v595_v39 }
 0x127   :  { %v350_v27 = vsub.f32 %v831_v46, %v958_v53 }
 0x128   :  { %v677_v26 = vpop.eup %676  ;;  %v583_v37 = vadd.f32 %v972_v5, %v564_v40  ;;  %v572_v38 = vmul.f32 %v964_v59, %v553_v41  ;;  %v994_v12 = vadd.f32 1e-06, %v334_v42  ;;  %v996_v47 = vadd.f32 1e-06, %v338_v44 }
 0x129   :  { %v462_v43 = vmul.f32 %v677_v26, %v373_v11  ;;  %v998_v49 = vpop.xlane.xlu2 %193  ;;  %v179_v50 = vpop.xlane.xlu0 %178  ;;  %vm468_vm13 = vweird.f32 %v677_v26 }
 0x12a   :  { %v599_v52 = vpack.c.bf16 %v583_v37, %v583_v37  ;;  %v591_v54 = vadd.f32 %v972_v5, %v572_v38  ;;  %678 = vrsqrt.f32 %v994_v12  ;;  %v1008_v0 = vmul.f32 %v931_v58, %v179_v50  ;;  %vm469_vm15 = vmor %vm467_vm14, %vm468_vm13 }
 0x12b   :  { %v463_v57 = vmul.f32 %v677_v26, %v462_v43  ;;  %680 = vrsqrt.f32 %v996_v47  ;;  %v257_v60 = vpop.xlane.xlu1 %256  ;;  %v303_v38 = vmul.f32 %v1023_v21, %v1023_v21  ;;  %vm397_vm2 = vweird.f32 %v994_v12 }
 0x12c   :  { %616 = vst.msk [vmem:[%s1248_s5 + $0x10] sm:$0xf] %vm611_vm6, %v599_v52  ;;  %v607_v63 = vpack.c.bf16 %v591_v54, %v591_v54  ;;  %v310_v62 = vmul.f32 %v1008_v0, %v1008_v0  ;;  %v291_v35 = vmul.f32 %v257_v60, %v931_v58  ;;  %vm437_vm4 = vweird.f32 %v996_v47 }
 0x12d   :  { %v464_v4 = vmul.f32 0.5, %v463_v57 }
 0x12e   :  { %624 = vst.msk [vmem:[%s1248_s5 + $0x30] sm:$0xf] %vm611_vm6, %v607_v63  ;;  %v326_v9 = vsub.f32 %v294_v30, %v310_v62 }
 0x12f   :  { %v465_v6 = vsub.f32 1.5, %v464_v4  ;;  %v354_v4 = vsub.f32 %v845_v55, %v967_v1 }
 0x130   :  { %v679_v8 = vpop.eup %678  ;;  %v342_v31 = vmax.f32 %v326_v9, 0.0 }
 0x131   :  { %v681_v13 = vpop.eup %680  ;;  %v466_v14 = vmul.f32 %v677_v26, %v465_v6  ;;  %v392_v15 = vmul.f32 %v679_v8, %v994_v12  ;;  %v269_v16 = vpop.xlane.xlu2 %268  ;;  %vm398_vm0 = vweird.f32 %v679_v8 }
 0x132   :  { %v170_v18 = vpop.xlane.xlu0 %169  ;;  %v432_v20 = vmul.f32 %v681_v13, %v996_v47  ;;  %v1028_v34 = vadd.f32 1e-06, %v342_v31  ;;  %v295_v39 = vmul.f32 %v269_v16, %v931_v58  ;;  %vm438_vm1 = vweird.f32 %v681_v13  ;;  %vm399_vm3 = vmor %vm397_vm2, %vm398_vm0 }
 0x133   :  { %v470_v2 = vsel %vm469_vm15, %v677_v26, %v466_v14  ;;  %v393_v22 = vmul.f32 %v679_v8, %v392_v15  ;;  %v1026_v24 = vmul.f32 %v931_v58, %v170_v18  ;;  %v182_v11 = vpop.xlane.xlu1 %181  ;;  %vm439_vm5 = vmor %vm437_vm4, %vm438_vm1 }
 0x134   :  { %v549_v25 = vmul.f32 %v470_v2, %v357_v19  ;;  %v433_v28 = vmul.f32 %v681_v13, %v432_v20  ;;  %v1031_v45 = vmul.f32 %v931_v58, %v182_v11  ;;  %682 = vrsqrt.f32 %v1028_v34 }
 0x135   :  { %v394_v36 = vmul.f32 0.5, %v393_v22  ;;  %v307_v51 = vmul.f32 %v1026_v24, %v1026_v24  ;;  %v1064_v19 = vmul.f32 %v931_v58, %v947_v29  ;;  %vm477_vm8 = vweird.f32 %v1028_v34 }
 0x136   :  { %v568_v40 = vmul.f32 %v964_v59, %v549_v25  ;;  %v434_v41 = vmul.f32 0.5, %v433_v28  ;;  %v311_v26 = vmul.f32 %v1031_v45, %v1031_v45 }
 0x137   :  { %v395_v42 = vsub.f32 1.5, %v394_v36  ;;  %v323_v44 = vsub.f32 %v291_v35, %v307_v51 }
 0x138   :  { %v587_v37 = vadd.f32 %v972_v5, %v568_v40  ;;  %v435_v43 = vsub.f32 1.5, %v434_v41  ;;  %v327_v53 = vsub.f32 %v295_v39, %v311_v26  ;;  %v314_v39 = vmul.f32 %v1064_v19, %v1064_v19 }
 0x139   :  { %v396_v50 = vmul.f32 %v679_v8, %v395_v42  ;;  %v339_v46 = vmax.f32 %v323_v44, 0.0  ;;  %v260_v52 = vpop.xlane.xlu2 %259  ;;  %v358_v41 = vsub.f32 %v856_v61, %v1008_v0  ;;  %v355_v42 = vsub.f32 %v865_v3, %v1026_v24 }
 0x13a   :  { %v245_v54 = vpop.xlane.xlu0 %244  ;;  %v603_v57 = vpack.c.bf16 %v587_v37, %v587_v37  ;;  %v436_v60 = vmul.f32 %v681_v13, %v435_v43  ;;  %v343_v6 = vmax.f32 %v327_v53, 0.0  ;;  %v683_v9 = vpop.eup %682  ;;  %v292_v24 = vmul.f32 %v260_v52, %v931_v58 }
 0x13b   :  { %v287_v63 = vmul.f32 %v245_v54, %v931_v58  ;;  %v400_v30 = vsel %vm399_vm3, %v679_v8, %v396_v50  ;;  %v1051_v62 = vadd.f32 1e-06, %v339_v46  ;;  %v161_v12 = vpop.xlane.xlu1 %160  ;;  %v472_v18 = vmul.f32 %v683_v9, %v1028_v34 }
 0x13c   :  { %620 = vst.msk [vmem:[%s1248_s5 + $0x20] sm:$0xf] %vm611_vm6, %v603_v57  ;;  %v542_v14 = vmul.f32 %v400_v30, %v350_v27  ;;  %v440_v15 = vsel %vm439_vm5, %v681_v13, %v436_v60  ;;  %v1060_v1 = vadd.f32 1e-06, %v343_v6  ;;  %v1076_v29 = vmul.f32 %v931_v58, %v161_v12 }
 0x13d   :  { %v319_v47 = vsub.f32 %v287_v63, %v303_v38  ;;  %v546_v16 = vmul.f32 %v440_v15, %v354_v4  ;;  %684 = vrsqrt.f32 %v1051_v62  ;;  %v473_v31 = vmul.f32 %v683_v9, %v472_v18 }
 0x13e   :  { %v561_v55 = vmul.f32 %v964_v59, %v542_v14  ;;  %686 = vrsqrt.f32 %v1060_v1  ;;  %vm478_vm7 = vweird.f32 %v683_v9  ;;  %v359_v38 = vsub.f32 %v876_v10, %v1031_v45 }
 0x13f   :  { %v335_v8 = vmax.f32 %v319_v47, 0.0  ;;  %v565_v20 = vmul.f32 %v964_v59, %v546_v16  ;;  %v474_v11 = vmul.f32 0.5, %v473_v31  ;;  %vm479_vm9 = vmor %vm477_vm8, %vm478_vm7  ;;  %vm447_vm10 = vweird.f32 %v1051_v62 }
 0x140   :  { %v580_v13 = vadd.f32 %v972_v5, %v561_v55  ;;  %v304_v43 = vmul.f32 %v1076_v29, %v1076_v29  ;;  %vm487_vm11 = vweird.f32 %v1060_v1 }
 0x141   :  { %v1069_v2 = vadd.f32 1e-06, %v335_v8  ;;  %v584_v22 = vadd.f32 %v972_v5, %v565_v20  ;;  %v185_v25 = vpop.xlane.xlu2 %184  ;;  %v475_v27 = vsub.f32 1.5, %v474_v11 }
 0x142   :  { %v1072_v28 = vpop.xlane.xlu0 %196  ;;  %v596_v36 = vpack.c.bf16 %v580_v13, %v580_v13  ;;  %v1090_v26 = vmul.f32 %v931_v58, %v185_v25 }
 0x143   :  { %688 = vrsqrt.f32 %v1069_v2  ;;  %v685_v35 = vpop.eup %684  ;;  %v600_v51 = vpack.c.bf16 %v584_v22, %v584_v22  ;;  %v173_v40 = vpop.xlane.xlu1 %172  ;;  %v476_v37 = vmul.f32 %v683_v9, %v475_v27  ;;  %vm407_vm1 = vweird.f32 %v1069_v2 }
 0x144   :  { %613 = vst.msk [vmem:[%s1248_s5 + $0x4] sm:$0xf] %vm611_vm6, %v596_v36  ;;  %v442_v44 = vmul.f32 %v685_v35, %v1051_v62  ;;  %v1100_v61 = vmul.f32 %v931_v58, %v173_v40  ;;  %v687_v3 = vpop.eup %686  ;;  %vm448_vm12 = vweird.f32 %v685_v35  ;;  %v312_v54 = vmul.f32 %v1090_v26, %v1090_v26 }
 0x145   :  { %617 = vst.msk [vmem:[%s1248_s5 + $0x14] sm:$0xf] %vm611_vm6, %v600_v51  ;;  %v480_v50 = vsel %vm479_vm9, %v683_v9, %v476_v37  ;;  %v482_v46 = vmul.f32 %v687_v3, %v1060_v1  ;;  %vm488_vm13 = vweird.f32 %v687_v3  ;;  %vm449_vm15 = vmor %vm447_vm10, %vm448_vm12  ;;  %v351_v1 = vsub.f32 %v848_v56, %v1023_v21 }
 0x146   :  { %v443_v0 = vmul.f32 %v685_v35, %v442_v44  ;;  %v308_v10 = vmul.f32 %v1100_v61, %v1100_v61  ;;  %v550_v45 = vmul.f32 %v480_v50, %v358_v41  ;;  %vm489_vm0 = vmor %vm487_vm11, %vm488_vm13 }
 0x147   :  { %v483_v57 = vmul.f32 %v687_v3, %v482_v46 }
 0x148   :  { %v444_v53 = vmul.f32 0.5, %v443_v0  ;;  %v324_v60 = vsub.f32 %v292_v24, %v308_v10  ;;  %v569_v30 = vmul.f32 %v964_v59, %v550_v45  ;;  %v1139_v24 = vmul.f32 %v931_v58, %v1072_v28 }
 0x149   :  { %v689_v34 = vpop.eup %688  ;;  %v278_v63 = vpop.xlane.xlu2 %277  ;;  %v484_v14 = vmul.f32 0.5, %v483_v57 }
 0x14a   :  { %v402_v52 = vmul.f32 %v689_v34, %v1069_v2  ;;  %v272_v4 = vpop.xlane.xlu0 %271  ;;  %v445_v6 = vsub.f32 1.5, %v444_v53  ;;  %v298_v12 = vmul.f32 %v278_v63, %v931_v58  ;;  %vm408_vm14 = vweird.f32 %v689_v34 }
 0x14b   :  { %v296_v9 = vmul.f32 %v272_v4, %v931_v58  ;;  %v340_v47 = vmax.f32 %v324_v60, 0.0  ;;  %v248_v16 = vpop.xlane.xlu1 %247  ;;  %v588_v18 = vadd.f32 %v972_v5, %v569_v30  ;;  %v485_v31 = vsub.f32 1.5, %v484_v14  ;;  %vm409_vm2 = vmor %vm407_vm1, %vm408_vm14 }
 0x14c   :  { %v403_v15 = vmul.f32 %v689_v34, %v402_v52  ;;  %v446_v55 = vmul.f32 %v685_v35, %v445_v6  ;;  %v330_v8 = vsub.f32 %v298_v12, %v314_v39  ;;  %v288_v11 = vmul.f32 %v248_v16, %v931_v58 }
 0x14d   :  { %v328_v20 = vsub.f32 %v296_v9, %v312_v54  ;;  %v1120_v22 = vadd.f32 1e-06, %v340_v47  ;;  %v604_v25 = vpack.c.bf16 %v588_v18, %v588_v18  ;;  %v486_v41 = vmul.f32 %v687_v3, %v485_v31 }
 0x14e   :  { %v404_v13 = vmul.f32 0.5, %v403_v15  ;;  %v450_v36 = vsel %vm449_vm15, %v685_v35, %v446_v55  ;;  %v346_v51 = vmax.f32 %v330_v8, 0.0  ;;  %v320_v39 = vsub.f32 %v288_v11, %v304_v43 }
 0x14f   :  { %v344_v27 = vmax.f32 %v328_v20, 0.0  ;;  %v547_v40 = vmul.f32 %v450_v36, %v355_v42  ;;  %690 = vrsqrt.f32 %v1120_v22  ;;  %621 = vst.msk [vmem:[%s1248_s5 + $0x24] sm:$0xf] %vm611_vm6, %v604_v25  ;;  %v490_v37 = vsel %vm489_vm0, %v687_v3, %v486_v41 }
 0x150   :  { %v405_v44 = vsub.f32 1.5, %v404_v13  ;;  %v1132_v62 = vadd.f32 1e-06, %v346_v51  ;;  %v1145_v2 = vmul.f32 %v931_v58, %v998_v49  ;;  %v551_v46 = vmul.f32 %v490_v37, %v359_v38 }
 0x151   :  { %v1134_v35 = vadd.f32 1e-06, %v344_v27  ;;  %v566_v42 = vmul.f32 %v964_v59, %v547_v40  ;;  %v336_v28 = vmax.f32 %v320_v39, 0.0  ;;  %v316_v57 = vmul.f32 %v1139_v24, %v1139_v24 }
 0x152   :  { %v406_v0 = vmul.f32 %v689_v34, %v405_v44  ;;  %v281_v50 = vpop.xlane.xlu0 %280  ;;  %692 = vrsqrt.f32 %v1132_v62  ;;  %v570_v45 = vmul.f32 %v964_v59, %v551_v46  ;;  %v315_v38 = vmul.f32 %v1145_v2, %v1145_v2 }
 0x153   :  { %v585_v3 = vadd.f32 %v972_v5, %v566_v42  ;;  %694 = vrsqrt.f32 %v1134_v35  ;;  %v284_v10 = vpop.xlane.xlu1 %283  ;;  %v299_v56 = vmul.f32 %v281_v50, %v931_v58  ;;  %vm457_vm4 = vweird.f32 %v1120_v22 }
 0x154   :  { %v410_v43 = vsel %vm409_vm2, %v689_v34, %v406_v0  ;;  %v300_v49 = vmul.f32 %v284_v10, %v931_v58  ;;  %v1158_v34 = vadd.f32 1e-06, %v336_v28  ;;  %v589_v52 = vadd.f32 %v972_v5, %v570_v45 }
 0x155   :  { %v543_v53 = vmul.f32 %v410_v43, %v351_v1  ;;  %v691_v21 = vpop.eup %690  ;;  %v601_v54 = vpack.c.bf16 %v585_v3, %v585_v3  ;;  %v331_v58 = vsub.f32 %v299_v56, %v315_v38  ;;  %v356_v44 = vsub.f32 %v887_v17, %v1100_v61 }
 0x156   :  { %v452_v63 = vmul.f32 %v691_v21, %v1120_v22  ;;  %696 = vrsqrt.f32 %v1158_v34  ;;  %v332_v4 = vsub.f32 %v300_v49, %v316_v57  ;;  %v605_v6 = vpack.c.bf16 %v589_v52, %v589_v52 }
 0x157   :  { %v562_v60 = vmul.f32 %v964_v59, %v543_v53  ;;  %618 = vst.msk [vmem:[%s1248_s5 + $0x18] sm:$0xf] %vm611_vm6, %v601_v54  ;;  %v347_v47 = vmax.f32 %v331_v58, 0.0  ;;  %vm458_vm3 = vweird.f32 %v691_v21  ;;  %vm517_vm9 = vweird.f32 %v1132_v62 }
 0x158   :  { %v693_v30 = vpop.eup %692  ;;  %v453_v9 = vmul.f32 %v691_v21, %v452_v63  ;;  %v348_v16 = vmax.f32 %v332_v4, 0.0  ;;  %622 = vst.msk [vmem:[%s1248_s5 + $0x28] sm:$0xf] %vm611_vm6, %v605_v6  ;;  %vm459_vm5 = vmor %vm457_vm4, %vm458_vm3  ;;  %v362_v22 = vsub.f32 %v834_v48, %v1064_v19  ;;  %vm497_vm11 = vweird.f32 %v1134_v35 }
 0x159   :  { %v581_v12 = vadd.f32 %v972_v5, %v562_v60  ;;  %v695_v14 = vpop.eup %694  ;;  %v512_v15 = vmul.f32 %v693_v30, %v1132_v62  ;;  %v1175_v31 = vadd.f32 1e-06, %v347_v47  ;;  %vm518_vm7 = vweird.f32 %v693_v30 }
 0x15a   :  { %v454_v55 = vmul.f32 0.5, %v453_v9  ;;  %v492_v8 = vmul.f32 %v695_v14, %v1134_v35  ;;  %v1177_v13 = vadd.f32 1e-06, %v348_v16  ;;  %vm498_vm8 = vweird.f32 %v695_v14  ;;  %vm519_vm10 = vmor %vm517_vm9, %vm518_vm7 }
 0x15b   :  { %v597_v18 = vpack.c.bf16 %v581_v12, %v581_v12  ;;  %v513_v20 = vmul.f32 %v693_v30, %v512_v15  ;;  %698 = vrsqrt.f32 %v1175_v31  ;;  %v360_v3 = vsub.f32 %v905_v32, %v1090_v26  ;;  %vm499_vm12 = vmor %vm497_vm11, %vm498_vm8 }
 0x15c   :  { %v455_v11 = vsub.f32 1.5, %v454_v55  ;;  %v493_v25 = vmul.f32 %v695_v14, %v492_v8  ;;  %v697_v36 = vpop.eup %696  ;;  %700 = vrsqrt.f32 %v1177_v13  ;;  %vm417_vm14 = vweird.f32 %v1158_v34 }
 0x15d   :  { %614 = vst.msk [vmem:[%s1248_s5 + $0x8] sm:$0xf] %vm611_vm6, %v597_v18  ;;  %v514_v51 = vmul.f32 0.5, %v513_v20  ;;  %v412_v41 = vmul.f32 %v697_v36, %v1158_v34  ;;  %vm418_vm13 = vweird.f32 %v697_v36  ;;  %vm527_vm1 = vweird.f32 %v1175_v31 }
 0x15e   :  { %v456_v27 = vmul.f32 %v691_v21, %v455_v11  ;;  %v494_v40 = vmul.f32 0.5, %v493_v25  ;;  %vm419_vm15 = vmor %vm417_vm14, %vm418_vm13  ;;  %vm537_vm4 = vweird.f32 %v1177_v13  ;;  %v364_v18 = vsub.f32 %v908_v33, %v1139_v24 }
 0x15f   :  { %v515_v39 = vsub.f32 1.5, %v514_v51  ;;  %v413_v0 = vmul.f32 %v697_v36, %v412_v41 }
 0x160   :  { %v460_v42 = vsel %vm459_vm5, %v691_v21, %v456_v27  ;;  %v495_v37 = vsub.f32 1.5, %v494_v40  ;;  %v352_v21 = vsub.f32 %v898_v23, %v1076_v29 }
 0x161   :  { %v548_v50 = vmul.f32 %v460_v42, %v356_v44  ;;  %v516_v1 = vmul.f32 %v693_v30, %v515_v39  ;;  %v414_v17 = vmul.f32 0.5, %v413_v0  ;;  %v699_v61 = vpop.eup %698 }
 0x162   :  { %v496_v46 = vmul.f32 %v695_v14, %v495_v37  ;;  %v522_v53 = vmul.f32 %v699_v61, %v1175_v31  ;;  %v701_v48 = vpop.eup %700  ;;  %vm528_vm0 = vweird.f32 %v699_v61 }
 0x163   :  { %v567_v43 = vmul.f32 %v964_v59, %v548_v50  ;;  %v520_v28 = vsel %vm519_vm10, %v693_v30, %v516_v1  ;;  %v415_v62 = vsub.f32 1.5, %v414_v17  ;;  %v532_v26 = vmul.f32 %v701_v48, %v1177_v13  ;;  %vm529_vm3 = vmor %vm527_vm1, %vm528_vm0 }
 0x164   :  { %v554_v10 = vmul.f32 %v520_v28, %v362_v22  ;;  %v500_v45 = vsel %vm499_vm12, %v695_v14, %v496_v46  ;;  %v523_v32 = vmul.f32 %v699_v61, %v522_v53  ;;  %vm538_vm2 = vweird.f32 %v701_v48 }
 0x165   :  { %v586_v19 = vadd.f32 %v972_v5, %v567_v43  ;;  %v552_v56 = vmul.f32 %v500_v45, %v360_v3  ;;  %v416_v49 = vmul.f32 %v697_v36, %v415_v62  ;;  %v533_v63 = vmul.f32 %v701_v48, %v532_v26  ;;  %vm539_vm5 = vmor %vm537_vm4, %vm538_vm2 }
 0x166   :  { %v573_v35 = vmul.f32 %v964_v59, %v554_v10  ;;  %v524_v60 = vmul.f32 0.5, %v523_v32  ;;  %v363_v14 = vsub.f32 %v871_v7, %v1145_v2 }
 0x167   :  { %v602_v38 = vpack.c.bf16 %v586_v19, %v586_v19  ;;  %v571_v54 = vmul.f32 %v964_v59, %v552_v56  ;;  %v420_v52 = vsel %vm419_vm15, %v697_v36, %v416_v49  ;;  %v534_v29 = vmul.f32 0.5, %v533_v63 }
 0x168   :  { %v592_v57 = vadd.f32 %v972_v5, %v573_v35  ;;  %v544_v58 = vmul.f32 %v420_v52, %v352_v21  ;;  %v525_v23 = vsub.f32 1.5, %v524_v60 }
 0x169   :  { %619 = vst.msk [vmem:[%s1248_s5 + $0x1c] sm:$0xf] %vm611_vm6, %v602_v38  ;;  %v590_v34 = vadd.f32 %v972_v5, %v571_v54  ;;  %v535_v9 = vsub.f32 1.5, %v534_v29 }
 0x16a   :  { %v608_v4 = vpack.c.bf16 %v592_v57, %v592_v57  ;;  %v563_v6 = vmul.f32 %v964_v59, %v544_v58  ;;  %v526_v12 = vmul.f32 %v699_v61, %v525_v23 }
 0x16b   :  { %v606_v30 = vpack.c.bf16 %v590_v34, %v590_v34  ;;  %v536_v16 = vmul.f32 %v701_v48, %v535_v9 }
 0x16c   :  { %625 = vst.msk [vmem:[%s1248_s5 + $0x34] sm:$0xf] %vm611_vm6, %v608_v4  ;;  %v582_v15 = vadd.f32 %v972_v5, %v563_v6  ;;  %v530_v47 = vsel %vm529_vm3, %v699_v61, %v526_v12 }
 0x16d   :  { %623 = vst.msk [vmem:[%s1248_s5 + $0x2c] sm:$0xf] %vm611_vm6, %v606_v30  ;;  %v555_v8 = vmul.f32 %v530_v47, %v363_v14  ;;  %v540_v20 = vsel %vm539_vm5, %v701_v48, %v536_v16 }
 0x16e   :  { %v598_v55 = vpack.c.bf16 %v582_v15, %v582_v15  ;;  %v556_v2 = vmul.f32 %v540_v20, %v364_v18 }
 0x16f   :  { %v574_v7 = vmul.f32 %v964_v59, %v555_v8 }
 0x170   :  { %615 = vst.msk [vmem:[%s1248_s5 + $0xc] sm:$0xf] %vm611_vm6, %v598_v55  ;;  %v575_v11 = vmul.f32 %v964_v59, %v556_v2 }
 0x171   :  { %v593_v31 = vadd.f32 %v972_v5, %v574_v7 }
 0x172   :  { %v594_v25 = vadd.f32 %v972_v5, %v575_v11 }
 0x173   :  { %v609_v13 = vpack.c.bf16 %v593_v31, %v593_v31 }
 0x174   :  { %v610_v33 = vpack.c.bf16 %v594_v25, %v594_v25 }
 0x175   :  { %626 = vst.msk [vmem:[%s1248_s5 + $0x38] sm:$0xf] %vm611_vm6, %v609_v13 }
 0x176   :  { %627 = vst.msk [vmem:[%s1248_s5 + $0x3c] sm:$0xf] %vm611_vm6, %v610_v33 }

</bundles_post_ra>
